<compile_context>
chip_gen: v6e
topology: v6e:2x2x1
jax: 0.10.0
libtpu: 0.0.40
codegen_flags: <defaults>
</compile_context>

<pallas_src>
import jax
import jax.numpy as jnp
from jax.experimental import pallas as pl
from jax.experimental.pallas import tpu as pltpu


def _round_up(x, m):
    return (x + m - 1) // m * m


def _msged_kernel(x_ref, we_ref, be_ref, wd_ref, bd_ref, y_ref, p_ref):
    """Fused encoder->decoder hot path (one batch tile per grid step).

    x_ref : (TB, M)  message bits (bf16, unpadded feature dim)
    we_ref: (M,  Y)  encoder weight (f32, resident)
    be_ref: (1,  Y)  encoder bias   (f32, resident)
    wd_ref: (Y,  M)  decoder weight (f32, resident)
    bd_ref: (1,  M)  decoder bias   (f32, resident)
    y_ref : (TB, Y)  latent output  (bf16)
    p_ref : (TB, M)  decoded message probabilities (bf16)
    """
    x = x_ref[...].astype(jnp.float32)

    # --- MsgEncoder: linear + tanh (f32 math, f32 MXU accumulate) ---
    h = jnp.dot(x, we_ref[...], preferred_element_type=jnp.float32) + be_ref[...]
    y = jnp.tanh(h)
    y_ref[...] = y.astype(y_ref.dtype)

    # --- MsgDecoder: linear + sigmoid ---
    logits = jnp.dot(y, wd_ref[...], preferred_element_type=jnp.float32) + bd_ref[...]
    p_ref[...] = jax.nn.sigmoid(logits).astype(p_ref.dtype)


def msged_forward(msg, w_enc, b_enc, w_dec, b_dec, *, block_b=4096,
                  io_dtype=jnp.bfloat16):
    """Run the fused MsgEncoder->MsgDecoder Pallas kernel.

    msg:   (B, M) float (0/1 message bits)
    returns (y, probs) with shapes (B, Y), (B, M) in io_dtype.
    """
    B, M = msg.shape
    Y = w_enc.shape[1]

    # Sublane multiple: 16 covers bf16 packing (and is a multiple of 8 for f32).
    SUB = 16

    # Adaptive batch tile: cap at block_b, minimize batch-padding waste, and
    # prefer >= 2 grid steps so the "parallel" axis engages both v7x TCs.
    tb0 = min(_round_up(block_b, SUB), _round_up(B, SUB))
    nsteps = max(1, -(-B // tb0))          # ceil(B / tb0)
    if nsteps == 1 and B >= 2 * SUB:
        nsteps = 2
    TB = _round_up(-(-B // nsteps), SUB)   # ceil(B / nsteps), rounded to sublane
    Bp = TB * nsteps

    x = msg.astype(io_dtype)
    if Bp != B:
        x = jnp.pad(x, ((0, Bp - B), (0, 0)))
    we = w_enc.astype(jnp.float32)
    be = b_enc.astype(jnp.float32).reshape(1, Y)
    wd = w_dec.astype(jnp.float32)
    bd = b_dec.astype(jnp.float32).reshape(1, M)

    io_bytes = jnp.dtype(io_dtype).itemsize
    cost = pl.CostEstimate(
        flops=4 * B * M * Y,                         # two (B,M)x(M,Y)-class matmuls
        transcendentals=B * (Y + M),                 # tanh + sigmoid
        bytes_accessed=(B * M + B * Y + B * M) * io_bytes
        + (M * Y + Y + Y * M + M) * 4,               # resident params (f32)
    )

    grid = (nsteps,)

    y_p, p_p = pl.pallas_call(
        _msged_kernel,
        out_shape=(
            jax.ShapeDtypeStruct((Bp, Y), io_dtype),
            jax.ShapeDtypeStruct((Bp, M), io_dtype),
        ),
        grid=grid,
        in_specs=[
            pl.BlockSpec((TB, M), lambda i: (i, 0)),   # x: tiled over batch
            pl.BlockSpec((M, Y), lambda i: (0, 0)),    # W_enc: resident
            pl.BlockSpec((1, Y), lambda i: (0, 0)),    # b_enc: resident
            pl.BlockSpec((Y, M), lambda i: (0, 0)),    # W_dec: resident
            pl.BlockSpec((1, M), lambda i: (0, 0)),    # b_dec: resident
        ],
        out_specs=(
            pl.BlockSpec((TB, Y), lambda i: (i, 0)),   # y latent
            pl.BlockSpec((TB, M), lambda i: (i, 0)),   # probs
        ),
        compiler_params=pltpu.CompilerParams(
            dimension_semantics=("parallel",),         # shard batch over v7x TCs
        ),
        cost_estimate=cost,
    )(x, we, be, wd, bd)

    # Only the (small) batch padding is sliced away; no feature padding exists.
    if Bp != B:
        y_p = y_p[:B]
        p_p = p_p[:B]
    return y_p, p_p


def init_params(key, msg_length, ydim):
    """Deterministic synthetic parameter init (Glorot-ish scaling)."""
    k1, k2, k3, k4 = jax.random.split(key, 4)
    w_enc = jax.random.normal(k1, (msg_length, ydim), jnp.float32) * (1.0 / jnp.sqrt(msg_length))
    b_enc = jax.random.normal(k2, (1, ydim), jnp.float32) * 0.01
    w_dec = jax.random.normal(k3, (ydim, msg_length), jnp.float32) * (1.0 / jnp.sqrt(ydim))
    b_dec = jax.random.normal(k4, (1, msg_length), jnp.float32) * 0.01
    return w_enc, b_enc, w_dec, b_dec


if __name__ == "__main__":
    # cfg: msg_length=8, ydim=32, noise=0.1 (<0.5), vimco_samples unused in fwd
    batch = 2
    msg_length = 8
    ydim = 32

    key = jax.random.PRNGKey(0)
    k_msg, k_par = jax.random.split(key)

    # binary message bits, as floats (exact in bf16)
    msg = jax.random.bernoulli(k_msg, 0.5, (batch, msg_length)).astype(jnp.float32)
    w_enc, b_enc, w_dec, b_dec = init_params(k_par, msg_length, ydim)

    y, probs = msged_forward(msg, w_enc, b_enc, w_dec, b_dec)
    jax.block_until_ready((y, probs))

    # lightweight sanity check against plain-JAX f32 reference (bf16 I/O tolerance)
    y_ref = jnp.tanh(msg @ w_enc + b_enc)
    p_ref = jax.nn.sigmoid(y_ref @ w_dec + b_dec)
    assert y.shape == (batch, ydim) and probs.shape == (batch, msg_length)
    assert jnp.allclose(y.astype(jnp.float32), y_ref, atol=1e-2), "latent mismatch"
    assert jnp.allclose(probs.astype(jnp.float32), p_ref, atol=1e-2), "probs mismatch"

    print("KERNEL_OK")
</pallas_src>

<mosaic_0001>
module attributes {stable_mosaic.version = 11 : i64} {
  func.func @_msged_kernel(%arg0: i32, %arg1: memref<16x8xbf16, #tpu.memory_space<vmem>>, %arg2: memref<8x32xf32, #tpu.memory_space<vmem>>, %arg3: memref<1x32xf32, #tpu.memory_space<vmem>>, %arg4: memref<32x8xf32, #tpu.memory_space<vmem>>, %arg5: memref<1x8xf32, #tpu.memory_space<vmem>>, %arg6: memref<16x32xbf16, #tpu.memory_space<vmem>>, %arg7: memref<16x8xbf16, #tpu.memory_space<vmem>>) attributes {dimension_semantics = [#tpu.dimension_semantics<parallel>], iteration_bounds = array<i64: 1>, scalar_prefetch = 0 : i64, scratch_operands = 0 : i64, tpu.core_type = #tpu.core_type<tc>, window_params = [{transform_indices = @transform_0, window_bounds = array<i64: 16, 8>}, {pipeline_mode = #tpu.pipeline_mode<synchronous>, transform_indices = @transform_1, window_bounds = array<i64: 8, 32>}, {pipeline_mode = #tpu.pipeline_mode<synchronous>, transform_indices = @transform_2, window_bounds = array<i64: 1, 32>}, {pipeline_mode = #tpu.pipeline_mode<synchronous>, transform_indices = @transform_3, window_bounds = array<i64: 32, 8>}, {pipeline_mode = #tpu.pipeline_mode<synchronous>, transform_indices = @transform_4, window_bounds = array<i64: 1, 8>}, {transform_indices = @transform_5, window_bounds = array<i64: 16, 32>}, {transform_indices = @transform_6, window_bounds = array<i64: 16, 8>}]} {
    %c0 = arith.constant 0 : index
    %c0_0 = arith.constant 0 : index
    %0 = vector.load %arg1[%c0, %c0_0] : memref<16x8xbf16, #tpu.memory_space<vmem>>, vector<16x8xbf16>
    %1 = arith.extf %0 : vector<16x8xbf16> to vector<16x8xf32>
    %c0_1 = arith.constant 0 : index
    %c0_2 = arith.constant 0 : index
    %2 = vector.load %arg2[%c0_1, %c0_2] : memref<8x32xf32, #tpu.memory_space<vmem>>, vector<8x32xf32>
    %cst = arith.constant dense<0.000000e+00> : vector<16x32xf32>
    %3 = tpu.matmul %1, %2, %cst {dimension_numbers = #tpu.dot_dimension_numbers<[1], [0], [0], [1], [0, 0, 1, 1], [], []>} : vector<16x8xf32>, vector<8x32xf32>, vector<16x32xf32> -> vector<16x32xf32>
    %c0_3 = arith.constant 0 : index
    %c0_4 = arith.constant 0 : index
    %4 = vector.load %arg3[%c0_3, %c0_4] : memref<1x32xf32, #tpu.memory_space<vmem>>, vector<1x32xf32>
    %5 = vector.broadcast %4 : vector<1x32xf32> to vector<16x32xf32>
    %6 = arith.addf %3, %5 : vector<16x32xf32>
    %7 = math.tanh %6 : vector<16x32xf32>
    %8 = arith.truncf %7 : vector<16x32xf32> to vector<16x32xbf16>
    %c0_5 = arith.constant 0 : index
    %c0_6 = arith.constant 0 : index
    %9 = vector.load %arg6[%c0_5, %c0_6] : memref<16x32xbf16, #tpu.memory_space<vmem>>, vector<16x32xbf16>
    tpu.vector_store %arg6[%c0_5, %c0_6], %8 {strides = array<i32>} : memref<16x32xbf16, #tpu.memory_space<vmem>>, vector<16x32xbf16>,
    %c0_7 = arith.constant 0 : index
    %c0_8 = arith.constant 0 : index
    %10 = vector.load %arg4[%c0_7, %c0_8] : memref<32x8xf32, #tpu.memory_space<vmem>>, vector<32x8xf32>
    %cst_9 = arith.constant dense<0.000000e+00> : vector<16x8xf32>
    %11 = tpu.matmul %7, %10, %cst_9 {dimension_numbers = #tpu.dot_dimension_numbers<[1], [0], [0], [1], [0, 0, 1, 1], [], []>} : vector<16x32xf32>, vector<32x8xf32>, vector<16x8xf32> -> vector<16x8xf32>
    %c0_10 = arith.constant 0 : index
    %c0_11 = arith.constant 0 : index
    %12 = vector.load %arg5[%c0_10, %c0_11] : memref<1x8xf32, #tpu.memory_space<vmem>>, vector<1x8xf32>
    %13 = vector.broadcast %12 : vector<1x8xf32> to vector<16x8xf32>
    %14 = arith.addf %11, %13 : vector<16x8xf32>
    %15 = arith.negf %14 : vector<16x8xf32>
    %16 = math.exp %15 : vector<16x8xf32>
    %cst_12 = arith.constant 1.000000e+00 : f32
    %17 = vector.broadcast %cst_12 : f32 to vector<16x8xf32>
    %18 = arith.addf %17, %16 : vector<16x8xf32>
    %19 = arith.divf %17, %18 : vector<16x8xf32>
    %20 = arith.truncf %19 : vector<16x8xf32> to vector<16x8xbf16>
    %c0_13 = arith.constant 0 : index
    %c0_14 = arith.constant 0 : index
    %21 = vector.load %arg7[%c0_13, %c0_14] : memref<16x8xbf16, #tpu.memory_space<vmem>>, vector<16x8xbf16>
    tpu.vector_store %arg7[%c0_13, %c0_14], %20 {strides = array<i32>} : memref<16x8xbf16, #tpu.memory_space<vmem>>, vector<16x8xbf16>,
    return
  }
  func.func @transform_0(%arg0: i32) -> (i32, i32) {
    %c0_i32 = arith.constant 0 : i32
    %c0_i32_0 = arith.constant 0 : i32
    return %arg0, %c0_i32 : i32, i32
  }
  func.func @transform_1(%arg0: i32) -> (i32, i32) {
    %c0_i32 = arith.constant 0 : i32
    %c0_i32_0 = arith.constant 0 : i32
    %c0_i32_1 = arith.constant 0 : i32
    return %c0_i32, %c0_i32_0 : i32, i32
  }
  func.func @transform_2(%arg0: i32) -> (i32, i32) {
    %c0_i32 = arith.constant 0 : i32
    %c0_i32_0 = arith.constant 0 : i32
    %c0_i32_1 = arith.constant 0 : i32
    return %c0_i32, %c0_i32_0 : i32, i32
  }
  func.func @transform_3(%arg0: i32) -> (i32, i32) {
    %c0_i32 = arith.constant 0 : i32
    %c0_i32_0 = arith.constant 0 : i32
    %c0_i32_1 = arith.constant 0 : i32
    return %c0_i32, %c0_i32_0 : i32, i32
  }
  func.func @transform_4(%arg0: i32) -> (i32, i32) {
    %c0_i32 = arith.constant 0 : i32
    %c0_i32_0 = arith.constant 0 : i32
    %c0_i32_1 = arith.constant 0 : i32
    return %c0_i32, %c0_i32_0 : i32, i32
  }
  func.func @transform_5(%arg0: i32) -> (i32, i32) {
    %c0_i32 = arith.constant 0 : i32
    %c0_i32_0 = arith.constant 0 : i32
    return %arg0, %c0_i32 : i32, i32
  }
  func.func @transform_6(%arg0: i32) -> (i32, i32) {
    %c0_i32 = arith.constant 0 : i32
    %c0_i32_0 = arith.constant 0 : i32
    return %arg0, %c0_i32 : i32, i32
  }
}

</mosaic_0001>

<bundles_post_ra>
// kernel: tpu_custom_call.1
= control target key start
LH: loop header
LB: loop body
LE: loop exit
PB: predicated region body
PF: predicated region fallthrough
CT: control target
= control target key end

     0   :  { %vm35_vm0 = vcmask 64512   ;;  %s419_s0 = inlined_call_operand.vmem [shape: bf16[16,8], index: 0, kind: input, shape index: {}]   ;;  %s420_s1 = inlined_call_operand.vmem [shape: f32[8,32], index: 1, kind: input, shape index: {}]   ;;  %s421_s2 = inlined_call_operand.vmem [shape: f32[1,32], index: 2, kind: input, shape index: {}]   ;;  %s422_s3 = inlined_call_operand.vmem [shape: f32[32,8], index: 3, kind: input, shape index: {}]   ;;  %s423_s4 = inlined_call_operand.vmem [shape: f32[1,8], index: 4, kind: input, shape index: {}]   ;;  %s424_s5 = inlined_call_operand.hbm [shape: bf16[16,32], index: 5, kind: output, shape index: {0}]   ;;  %s425_s6 = inlined_call_operand.vmem [shape: bf16[16,8], index: 6, kind: output, shape index: {1}]  }
   0x1   :  { %v27_v0 = vld [vmem:[%s420_s1] sm:$0xff] }
   0x2   :  { %v283_v1 = vld [vmem:[%s419_s0] sm:$0xff]  }
   0x3   :  { %12 = vsyncpa [#allocation3], 0  ;;  %295 = vmatprep.subr.mxu0 %v27_v0  ;;  %v284_v2 = vunpack.c.l.bf16 %v283_v1  ;;  %v285_v3 = vunpack.c.h.bf16 %v283_v1  ;;  %v133_v4 = vld [vmem:[%s422_s3 + $0x18] sm:$0xff]  ;;  %v132_v5 = vld [vmem:[%s422_s3 + $0x10] sm:$0xff]  ;;  %vm141_vm1 = vcmask 261120   ;;  %vm127_vm2 = vcmask 257024  }
   0x4   :  { %296 = vmatpush3.msra.mxu0 %v27_v0  ;;  %300 = vmatprep.subr.mxu1 %v133_v4  ;;  %v131_v6 = vld [vmem:[%s422_s3 + $0x8] sm:$0xff]  ;;  %v130_v7 = vld [vmem:[%s422_s3] sm:$0xff]  ;;  %s348_s3 = smov [#allocation2]  }
   0x5   :  { %297 = vmatprep.mubr.msk.f32.mxu0 %vm35_vm0, %v284_v2  ;;  %301 = vmatpush3.msra.mxu1 %v133_v4  ;;  %v266_v8 = vld [vmem:[%s421_s2] ss:$0 sm:$0xff]  ;;  %s251_s9 = sshll.u32 %s348_s3, 4  ;;  %s252_s9 = int_to_ptr.vmem [resolvable:$true] %s251_s9 }
   0x6   :  { %298 = vmatmul.mubr.msk.f32.vlgmr.msra.gmra.mxu0 %vm35_vm0, %v285_v3  ;;  %302 = vmatprep.subr.mxu1 %v132_v5  ;;  %s326_s2 = scalar_lea.vmem %s252_s9, 128  ;;  %p331_p1 = scmp.lt.s32.totalorder %s252_s9, %s252_s9 }
   0x7   :  { %303 = vmatpush3.msra.mxu1 %v132_v5  ;;  %p327_p0 = scmp.ne.s32.totalorder %s252_s9, %s326_s2  ;;  %p332_p2 = scmp.lt.s32.totalorder %s326_s2, %s326_s2 }
   0x8   :  { %304 = vmatprep.subr.mxu1 %v131_v6 }
   0x9   :  { %305 = vmatpush3.msra.mxu1 %v131_v6  ;;  %p333_p3 = por %p332_p2, %p331_p1 }
   0xa   :  { %306 = vmatprep.subr.mxu1 %v130_v7 }
   0xb   :  { %307 = vmatpush3.msra.mxu1 %v130_v7  ;;  %p334_p4 = pnand %p333_p3, %p327_p0 }
  0xc6   :  { %v299_v9 = vpop.f32.mrf.mxu0 }
  0xc7   :  { %v114_v10 = vadd.f32 %v299_v9, %v266_v8 }
  0xc8   :  { %v108_v11 = vpop.f32.mrf.mxu0 }
  0xc9   :  { %314 = vtanh.f32 %v114_v10  ;;  %v109_v12 = vadd.f32 %v266_v8, %v108_v11 }
  0xcb   :  { %316 = vtanh.f32 %v109_v12 }
  0xd6   :  { %v315_v13 = vpop.eup %314 }
  0xd7   :  { %v279_v14 = vpack.c.bf16 %v315_v13, %v315_v13 }
  0xd8   :  { %v317_v15 = vpop.eup %316 }
  0xd9   :  { %308 = vmatprep.mubr.msk.f32.mxu1 %vm141_vm1, %v317_v15  ;;  %v278_v16 = vpack.c.bf16 %v317_v15, %v317_v15  ;;  %129 = vst.msk [vmem:[#allocation2 + $0x4] sm:$0xf] %vm127_vm2, %v279_v14 }
  0xda   :  { %309 = vmatmul.mubr.msk.f32.vlgmr.msra.gmra.mxu1 %vm141_vm1, %v315_v13 }
  0xdb   :  { %128 = vst.msk [vmem:[#allocation2] sm:$0xf] %vm127_vm2, %v278_v16 }
  0xdc   :  { %337 = shalt.err (!%p334_p4)
}
  0xdd   :  { %s349_s10 = smov 64   ;;  %s350_s11 = smov 4   ;;  %v271_v17 = vld [vmem:[%s423_s4] ss:$0 sm:$0xff]  ;;  %vm243_vm3 = vcmask 60416  }
  0xde   :  { %257 = dma.vmem_to_hbm [thread:$0]  %s252_s9, 128, %s424_s5, [#allocation3], %s349_s10, %s349_s10, %s350_s11  }
 0x19a   :  { %v310_v18 = vpop.f32.mrf.mxu1 }
 0x19b   :  { %v220_v19 = vadd.f32 %v310_v18, %v271_v17 }
 0x19c   :  { %v214_v20 = vpop.f32.mrf.mxu1 }
 0x19d   :  { %v275_v21 = vmul.f32 -1.442695, %v220_v19  ;;  %v215_v22 = vadd.f32 %v271_v17, %v214_v20 }
 0x19f   :  { %318 = vpow2.f32 %v275_v21  ;;  %v274_v23 = vmul.f32 -1.442695, %v215_v22 }
 0x1a1   :  { %320 = vpow2.f32 %v274_v23 }
 0x1ac   :  { %v319_v24 = vpop.eup %318 }
 0x1ad   :  { %v230_v25 = vadd.f32 1.0, %v319_v24 }
 0x1ae   :  { %v321_v26 = vpop.eup %320 }
 0x1af   :  { %322 = vrcp.f32 %v230_v25  ;;  %v229_v27 = vadd.f32 1.0, %v321_v26 }
 0x1b1   :  { %324 = vrcp.f32 %v229_v27 }
 0x1bc   :  { %v323_v28 = vpop.eup %322 }
 0x1bd   :  { %v281_v29 = vpack.c.bf16 %v323_v28, %v323_v28 }
 0x1be   :  { %v325_v30 = vpop.eup %324 }
 0x1bf   :  { %245 = vst.msk [vmem:[%s425_s6 + $0x4] sm:$0xf] %vm243_vm3, %v281_v29  ;;  %v280_v31 = vpack.c.bf16 %v325_v30, %v325_v30 }
 0x1c1   :  { %244 = vst.msk [vmem:[%s425_s6] sm:$0xf] %vm243_vm3, %v280_v31 }
 0x1c2   :  { %346 = dma.done.wait [#allocation3], 128  }
 0x1c3   :  { %347 = vsyncadd [#allocation3], 4294967168 }
 0x1c4   :  { %265 = vsyncpa [#allocation3], 1 }

</bundles_post_ra>
